<compile_context>
chip_gen: v6e
topology: v6e:2x2x1
jax: 0.10.0
libtpu: 0.0.40
codegen_flags: <defaults>
</compile_context>

<pallas_src>
import functools

import jax
import jax.numpy as jnp
from jax.experimental import pallas as pl
from jax.experimental.pallas import tpu as pltpu


def _mlp_kernel(x_ref, w1_ref, b1_ref, w2_ref, b2_ref, o_ref):
    # Hidden layer: (TB, in) @ (in, H) -> f32 accumulate, +bias, ReLU.
    h = jnp.dot(x_ref[...], w1_ref[...], preferred_element_type=jnp.float32)
    h = h + b1_ref[...]                      # (1, H) broadcasts over rows
    h = jnp.maximum(h, 0.0)
    # Output layer: (TB, H) @ (H, out) -> f32 accumulate, +bias.
    y = jnp.dot(h.astype(w2_ref.dtype), w2_ref[...],
                preferred_element_type=jnp.float32)
    y = y + b2_ref[...]
    o_ref[...] = y.astype(o_ref.dtype)


@functools.partial(jax.jit, static_argnames=("block_b", "compute_dtype"))
def net_forward(x, w1_t, b1, w2_t, b2, *, block_b=256, compute_dtype=None):
    """MLP forward: relu(x @ w1_t + b1) @ w2_t + b2.

    x:    (B, in)        float32
    w1_t: (in, H)        float32 (PyTorch linear1.weight, transposed)
    b1:   (1, H)         float32
    w2_t: (H, out)       float32 (PyTorch linear2.weight, transposed)
    b2:   (1, out)       float32
    block_b:       batch tile size (multiple of 8).
    compute_dtype: e.g. jnp.bfloat16 to run the MXU in bf16 on v6e/v7x;
                   None keeps full f32 (matches PyTorch numerics).
    """
    B, in_size = x.shape
    hidden = w1_t.shape[1]
    out_size = w2_t.shape[1]

    if compute_dtype is not None:
        x = x.astype(compute_dtype)
        w1_t = w1_t.astype(compute_dtype)
        w2_t = w2_t.astype(compute_dtype)
    # Biases are added post-accumulation in f32 regardless of compute dtype.
    b1 = b1.astype(jnp.float32)
    b2 = b2.astype(jnp.float32)

    # Batch tile: multiple of 8 sublanes, capped at block_b; pad B up so every
    # grid step sees a full tile (padded rows are sliced off at the end).
    tb = min(block_b, pl.cdiv(B, 8) * 8)
    padded_b = pl.cdiv(B, tb) * tb
    if padded_b != B:
        x = jnp.pad(x, ((0, padded_b - B), (0, 0)))
    grid = (padded_b // tb,)

    out = pl.pallas_call(
        _mlp_kernel,
        out_shape=jax.ShapeDtypeStruct((padded_b, out_size), jnp.float32),
        grid_spec=pl.GridSpec(
            grid=grid,
            in_specs=[
                # x: tiled over the batch axis.
                pl.BlockSpec((tb, in_size), lambda i: (i, 0)),
                # Weights / biases: same block every step -> stay VMEM-resident.
                pl.BlockSpec((in_size, hidden), lambda i: (0, 0)),
                pl.BlockSpec((1, hidden), lambda i: (0, 0)),
                pl.BlockSpec((hidden, out_size), lambda i: (0, 0)),
                pl.BlockSpec((1, out_size), lambda i: (0, 0)),
            ],
            out_specs=pl.BlockSpec((tb, out_size), lambda i: (i, 0)),
        ),
        compiler_params=pltpu.CompilerParams(
            dimension_semantics=("parallel",)),
    )(x, w1_t, b1, w2_t, b2)
    return out[:B]


def reference_forward(x, w1_t, b1, w2_t, b2):
    h = jnp.maximum(
        jnp.dot(x, w1_t, preferred_element_type=jnp.float32) + b1, 0.0)
    return jnp.dot(h.astype(w2_t.dtype), w2_t,
                   preferred_element_type=jnp.float32) + b2


if __name__ == "__main__":
    # Shapes consistent with the module: Net(input_size, hidden_size, output_size)
    batch = 1000           # non-multiple of the tile to exercise padding
    input_size = 16
    hidden_size = 32
    output_size = 4

    key = jax.random.PRNGKey(0)
    kx, kw1, kb1, kw2, kb2 = jax.random.split(key, 5)

    x = jax.random.normal(kx, (batch, input_size), dtype=jnp.float32)

    # Deterministic init mirroring the module: weight ~ N(0, 0.1),
    # bias from default nn.Linear uniform(-1/sqrt(fan_in), 1/sqrt(fan_in)).
    # PyTorch weight shape is (out, in); we store the transpose (in, out).
    w1_t = 0.1 * jax.random.normal(kw1, (input_size, hidden_size), dtype=jnp.float32)
    w2_t = 0.1 * jax.random.normal(kw2, (hidden_size, output_size), dtype=jnp.float32)
    bound1 = 1.0 / (input_size ** 0.5)
    bound2 = 1.0 / (hidden_size ** 0.5)
    b1 = jax.random.uniform(kb1, (1, hidden_size), minval=-bound1, maxval=bound1,
                            dtype=jnp.float32)
    b2 = jax.random.uniform(kb2, (1, output_size), minval=-bound2, maxval=bound2,
                            dtype=jnp.float32)

    # Full-precision path (matches PyTorch f32 semantics).
    out_f32 = jax.block_until_ready(
        net_forward(x, w1_t, b1, w2_t, b2, block_b=256))
    ref_f32 = reference_forward(x, w1_t, b1, w2_t, b2)
    assert out_f32.shape == (batch, output_size)
    assert jnp.allclose(out_f32, ref_f32, atol=1e-5, rtol=1e-5)

    # bf16 MXU path (v6e/v7x fast path), f32 accumulation preserved.
    out_bf16 = jax.block_until_ready(
        net_forward(x, w1_t, b1, w2_t, b2, block_b=256,
                    compute_dtype=jnp.bfloat16))
    ref_bf16 = reference_forward(
        x.astype(jnp.bfloat16), w1_t.astype(jnp.bfloat16), b1,
        w2_t.astype(jnp.bfloat16), b2)
    assert jnp.allclose(out_bf16, ref_bf16, atol=2e-2, rtol=2e-2)

    print("KERNEL_OK")
</pallas_src>

<mosaic_0001>
module attributes {stable_mosaic.version = 11 : i64} {
  func.func @_mlp_kernel(%arg0: i32, %arg1: memref<256x16xf32, #tpu.memory_space<vmem>>, %arg2: memref<16x32xf32, #tpu.memory_space<vmem>>, %arg3: memref<1x32xf32, #tpu.memory_space<vmem>>, %arg4: memref<32x4xf32, #tpu.memory_space<vmem>>, %arg5: memref<1x4xf32, #tpu.memory_space<vmem>>, %arg6: memref<256x4xf32, #tpu.memory_space<vmem>>) attributes {dimension_semantics = [#tpu.dimension_semantics<parallel>], iteration_bounds = array<i64: 4>, scalar_prefetch = 0 : i64, scratch_operands = 0 : i64, tpu.core_type = #tpu.core_type<tc>, window_params = [{transform_indices = @transform_0, window_bounds = array<i64: 256, 16>}, {pipeline_mode = #tpu.pipeline_mode<synchronous>, transform_indices = @transform_1, window_bounds = array<i64: 16, 32>}, {pipeline_mode = #tpu.pipeline_mode<synchronous>, transform_indices = @transform_2, window_bounds = array<i64: 1, 32>}, {pipeline_mode = #tpu.pipeline_mode<synchronous>, transform_indices = @transform_3, window_bounds = array<i64: 32, 4>}, {pipeline_mode = #tpu.pipeline_mode<synchronous>, transform_indices = @transform_4, window_bounds = array<i64: 1, 4>}, {transform_indices = @transform_5, window_bounds = array<i64: 256, 4>}]} {
    %c0 = arith.constant 0 : index
    %c0_0 = arith.constant 0 : index
    %0 = vector.load %arg1[%c0, %c0_0] : memref<256x16xf32, #tpu.memory_space<vmem>>, vector<256x16xf32>
    %c0_1 = arith.constant 0 : index
    %c0_2 = arith.constant 0 : index
    %1 = vector.load %arg2[%c0_1, %c0_2] : memref<16x32xf32, #tpu.memory_space<vmem>>, vector<16x32xf32>
    %cst = arith.constant dense<0.000000e+00> : vector<256x32xf32>
    %2 = tpu.matmul %0, %1, %cst {dimension_numbers = #tpu.dot_dimension_numbers<[1], [0], [0], [1], [0, 0, 1, 1], [], []>} : vector<256x16xf32>, vector<16x32xf32>, vector<256x32xf32> -> vector<256x32xf32>
    %c0_3 = arith.constant 0 : index
    %c0_4 = arith.constant 0 : index
    %3 = vector.load %arg3[%c0_3, %c0_4] : memref<1x32xf32, #tpu.memory_space<vmem>>, vector<1x32xf32>
    %4 = vector.broadcast %3 : vector<1x32xf32> to vector<256x32xf32>
    %5 = arith.addf %2, %4 : vector<256x32xf32>
    %cst_5 = arith.constant 0.000000e+00 : f32
    %6 = vector.broadcast %cst_5 : f32 to vector<256x32xf32>
    %7 = arith.maximumf %5, %6 : vector<256x32xf32>
    %c0_6 = arith.constant 0 : index
    %c0_7 = arith.constant 0 : index
    %8 = vector.load %arg4[%c0_6, %c0_7] : memref<32x4xf32, #tpu.memory_space<vmem>>, vector<32x4xf32>
    %cst_8 = arith.constant dense<0.000000e+00> : vector<256x4xf32>
    %9 = tpu.matmul %7, %8, %cst_8 {dimension_numbers = #tpu.dot_dimension_numbers<[1], [0], [0], [1], [0, 0, 1, 1], [], []>} : vector<256x32xf32>, vector<32x4xf32>, vector<256x4xf32> -> vector<256x4xf32>
    %c0_9 = arith.constant 0 : index
    %c0_10 = arith.constant 0 : index
    %10 = vector.load %arg5[%c0_9, %c0_10] : memref<1x4xf32, #tpu.memory_space<vmem>>, vector<1x4xf32>
    %11 = vector.broadcast %10 : vector<1x4xf32> to vector<256x4xf32>
    %12 = arith.addf %9, %11 : vector<256x4xf32>
    %c0_11 = arith.constant 0 : index
    %c0_12 = arith.constant 0 : index
    %13 = vector.load %arg6[%c0_11, %c0_12] : memref<256x4xf32, #tpu.memory_space<vmem>>, vector<256x4xf32>
    tpu.vector_store %arg6[%c0_11, %c0_12], %12 {strides = array<i32>} : memref<256x4xf32, #tpu.memory_space<vmem>>, vector<256x4xf32>,
    return
  }
  func.func @transform_0(%arg0: i32) -> (i32, i32) {
    %c0_i32 = arith.constant 0 : i32
    %c0_i32_0 = arith.constant 0 : i32
    return %arg0, %c0_i32 : i32, i32
  }
  func.func @transform_1(%arg0: i32) -> (i32, i32) {
    %c0_i32 = arith.constant 0 : i32
    %c0_i32_0 = arith.constant 0 : i32
    %c0_i32_1 = arith.constant 0 : i32
    return %c0_i32, %c0_i32_0 : i32, i32
  }
  func.func @transform_2(%arg0: i32) -> (i32, i32) {
    %c0_i32 = arith.constant 0 : i32
    %c0_i32_0 = arith.constant 0 : i32
    %c0_i32_1 = arith.constant 0 : i32
    return %c0_i32, %c0_i32_0 : i32, i32
  }
  func.func @transform_3(%arg0: i32) -> (i32, i32) {
    %c0_i32 = arith.constant 0 : i32
    %c0_i32_0 = arith.constant 0 : i32
    %c0_i32_1 = arith.constant 0 : i32
    return %c0_i32, %c0_i32_0 : i32, i32
  }
  func.func @transform_4(%arg0: i32) -> (i32, i32) {
    %c0_i32 = arith.constant 0 : i32
    %c0_i32_0 = arith.constant 0 : i32
    %c0_i32_1 = arith.constant 0 : i32
    return %c0_i32, %c0_i32_0 : i32, i32
  }
  func.func @transform_5(%arg0: i32) -> (i32, i32) {
    %c0_i32 = arith.constant 0 : i32
    %c0_i32_0 = arith.constant 0 : i32
    return %arg0, %c0_i32 : i32, i32
  }
}

</mosaic_0001>

<bundles_post_ra>
// kernel: net_forward.1
= control target key start
LH: loop header
LB: loop body
LE: loop exit
PB: predicated region body
PF: predicated region fallthrough
CT: control target
= control target key end

     0   :  { %s1346_s18 = smov 0   ;;  %s1626_s0 = inlined_call_operand.vmem [shape: f32[1024,16], index: 0, kind: input, shape index: {}]   ;;  %s1627_s1 = inlined_call_operand.vmem [shape: f32[16,32], index: 1, kind: input, shape index: {}]   ;;  %s1628_s2 = inlined_call_operand.vmem [shape: f32[1,32], index: 2, kind: input, shape index: {}]   ;;  %s1629_s3 = inlined_call_operand.vmem [shape: f32[32,4], index: 3, kind: input, shape index: {}]   ;;  %s1630_s4 = inlined_call_operand.vmem [shape: f32[1,4], index: 4, kind: input, shape index: {}]   ;;  %s1631_s5 = inlined_call_operand.vmem [shape: f32[1024,4], index: 5, kind: output, shape index: {}]  }
   0x1 LB: > { %s1045_s19 = sadd.s32 4294967295, %s1314_s18   ;;  %p1049_p0 = scmp.ge.s32.totalorder %s1314_s18, 1  ;;  %s1314_s18 = sphi %s1346_s18, %s15_s18  }
   0x2   : > { %p188_p1 = scmp.lt.s32.totalorder %s1314_s18, 5 }
   0x4   : > { %p189_p2 = pnand %p1049_p0, %p188_p1 }
   0x5   : > { %s1050_s24 = sshll.u32 (!%p189_p2), %s1045_s19, 5 }
   0x6   : > { %192 = sbr.rel (%p189_p2) target bundleno = 474 (0x1da), region = 40  ;;  %p217_p3 = scmp.lt.s32.totalorder (!%p189_p2), %s1050_s24, 127 }
   0xb   : > { %v261_v0 = vld [vmem:[%s1627_s1 + $0x8] sm:$0xff]  ;;  %v260_v1 = vld [vmem:[%s1627_s1] sm:$0xff]  ;;  %s1633_s24 = smov (!%p217_p3, %s1050_s24), 127  ;;  %vm269_vm0 = vcmask 130048   ;;  %v626_v34 = vld [vmem:[%s1629_s3 + $0x18] sm:$0xff]  ;;  %vm634_vm1 = vcmask 261120  }
   0xc   : > { %1192 = vmatprep.subr.mxu0 %v261_v0  ;;  %s1051_s25 = sshll.u32 %s1633_s24, 3  ;;  %1244 = vmatprep.subr.mxu1 %v626_v34  ;;  %v625_v35 = vld [vmem:[%s1629_s3 + $0x10] sm:$0xff]  ;;  %v624_v36 = vld [vmem:[%s1629_s3 + $0x8] sm:$0xff]  ;;  %v623_v37 = vld [vmem:[%s1629_s3] sm:$0xff]  ;;  %vm956_vm2 = vcmask 31744  }
   0xd   : > { %1193 = vmatpush3.msra.mxu0 %v261_v0  ;;  %s1368_s28 = scalar_lea.vmem %s1626_s0, %s1051_s25  ;;  %1245 = vmatpush3.msra.mxu1 %v626_v34  ;;  %v1449_v38 = vld [vmem:[%s1628_s2] ss:$0 sm:$0xff]  ;;  %s1525_s19 = scalar_lea.vmem %s1631_s5, %s1051_s25 }
   0xe   : > { %1194 = vmatprep.subr.mxu0 %v260_v1  ;;  %v228_v2 = vld [vmem:[%s1368_s28] sm:$0xff]  ;;  %v229_v3 = vld [vmem:[%s1368_s28 + $0x8] sm:$0xff]  ;;  %v230_v4 = vld [vmem:[%s1368_s28 + $0x10] sm:$0xff]  ;;  %1246 = vmatprep.subr.mxu1 %v625_v35 }
   0xf   : > { %1195 = vmatpush3.msra.mxu0 %v260_v1  ;;  %1196 = vmatprep.mubr.msk.f32.mxu0 %vm269_vm0, %v228_v2  ;;  %v231_v5 = vld [vmem:[%s1368_s28 + $0x18] sm:$0xff]  ;;  %v232_v6 = vld [vmem:[%s1368_s28 + $0x20] sm:$0xff]  ;;  %v233_v7 = vld [vmem:[%s1368_s28 + $0x28] sm:$0xff] }
  0x10   : > { %1197 = vmatmul.mubr.msk.f32.vlgmr.msra.gmra.mxu0 %vm269_vm0, %v229_v3  ;;  %v234_v8 = vld [vmem:[%s1368_s28 + $0x30] sm:$0xff]  ;;  %v235_v9 = vld [vmem:[%s1368_s28 + $0x38] sm:$0xff]  ;;  %v236_v10 = vld [vmem:[%s1368_s28 + $0x40] sm:$0xff]  ;;  %1247 = vmatpush3.msra.mxu1 %v625_v35 }
  0x11   : > { %1199 = vmatprep.mubr.msk.f32.mxu0 %vm269_vm0, %v230_v4  ;;  %v237_v11 = vld [vmem:[%s1368_s28 + $0x48] sm:$0xff]  ;;  %v238_v12 = vld [vmem:[%s1368_s28 + $0x50] sm:$0xff]  ;;  %v239_v13 = vld [vmem:[%s1368_s28 + $0x58] sm:$0xff]  ;;  %1248 = vmatprep.subr.mxu1 %v624_v36 }
  0x12   : > { %v240_v14 = vld [vmem:[%s1368_s28 + $0x60] sm:$0xff]  ;;  %v241_v15 = vld [vmem:[%s1368_s28 + $0x68] sm:$0xff]  ;;  %v242_v16 = vld [vmem:[%s1368_s28 + $0x70] sm:$0xff]  ;;  %1249 = vmatpush3.msra.mxu1 %v624_v36 }
  0x13   : > { %v243_v17 = vld [vmem:[%s1368_s28 + $0x78] sm:$0xff]  ;;  %v244_v18 = vld [vmem:[%s1368_s28 + $0x80] sm:$0xff]  ;;  %v245_v19 = vld [vmem:[%s1368_s28 + $0x88] sm:$0xff]  ;;  %1250 = vmatprep.subr.mxu1 %v623_v37 }
  0x14   : > { %1200 = vmatmul.mubr.msk.f32.gmra.mxu0 %vm269_vm0, %v231_v5  ;;  %v246_v20 = vld [vmem:[%s1368_s28 + $0x90] sm:$0xff]  ;;  %v247_v21 = vld [vmem:[%s1368_s28 + $0x98] sm:$0xff]  ;;  %v248_v22 = vld [vmem:[%s1368_s28 + $0xa0] sm:$0xff]  ;;  %1251 = vmatpush3.msra.mxu1 %v623_v37 }
  0x15   : > { %1202 = vmatprep.mubr.msk.f32.mxu0 %vm269_vm0, %v232_v6  ;;  %v249_v23 = vld [vmem:[%s1368_s28 + $0xa8] sm:$0xff]  ;;  %v250_v24 = vld [vmem:[%s1368_s28 + $0xb0] sm:$0xff]  ;;  %v251_v25 = vld [vmem:[%s1368_s28 + $0xb8] sm:$0xff] }
  0x16   : > { %v252_v26 = vld [vmem:[%s1368_s28 + $0xc0] sm:$0xff]  ;;  %v253_v27 = vld [vmem:[%s1368_s28 + $0xc8] sm:$0xff]  ;;  %v254_v28 = vld [vmem:[%s1368_s28 + $0xd0] sm:$0xff] }
  0x17   : > { %v255_v29 = vld [vmem:[%s1368_s28 + $0xd8] sm:$0xff]  ;;  %v256_v30 = vld [vmem:[%s1368_s28 + $0xe0] sm:$0xff]  ;;  %v257_v31 = vld [vmem:[%s1368_s28 + $0xe8] sm:$0xff] }
  0x18   : > { %1203 = vmatmul.mubr.msk.f32.gmra.mxu0 %vm269_vm0, %v233_v7  ;;  %v258_v32 = vld [vmem:[%s1368_s28 + $0xf0] sm:$0xff]  ;;  %v259_v33 = vld [vmem:[%s1368_s28 + $0xf8] sm:$0xff] }
  0x19   : > { %1205 = vmatprep.mubr.msk.f32.mxu0 %vm269_vm0, %v234_v8 }
  0x1c   : > { %1206 = vmatmul.mubr.msk.f32.gmra.mxu0 %vm269_vm0, %v235_v9 }
  0x1d   : > { %1208 = vmatprep.mubr.msk.f32.mxu0 %vm269_vm0, %v236_v10 }
  0x20   : > { %1209 = vmatmul.mubr.msk.f32.gmra.mxu0 %vm269_vm0, %v237_v11 }
  0x21   : > { %1211 = vmatprep.mubr.msk.f32.mxu0 %vm269_vm0, %v238_v12 }
  0x24   : > { %1212 = vmatmul.mubr.msk.f32.gmra.mxu0 %vm269_vm0, %v239_v13 }
  0x25   : > { %1214 = vmatprep.mubr.msk.f32.mxu0 %vm269_vm0, %v240_v14 }
  0x28   : > { %1215 = vmatmul.mubr.msk.f32.gmra.mxu0 %vm269_vm0, %v241_v15 }
  0x29   : > { %1217 = vmatprep.mubr.msk.f32.mxu0 %vm269_vm0, %v242_v16 }
  0x2c   : > { %1218 = vmatmul.mubr.msk.f32.gmra.mxu0 %vm269_vm0, %v243_v17 }
  0x2d   : > { %1220 = vmatprep.mubr.msk.f32.mxu0 %vm269_vm0, %v244_v18 }
  0x30   : > { %1221 = vmatmul.mubr.msk.f32.gmra.mxu0 %vm269_vm0, %v245_v19 }
  0x31   : > { %1223 = vmatprep.mubr.msk.f32.mxu0 %vm269_vm0, %v246_v20 }
  0x34   : > { %1224 = vmatmul.mubr.msk.f32.gmra.mxu0 %vm269_vm0, %v247_v21 }
  0x35   : > { %1226 = vmatprep.mubr.msk.f32.mxu0 %vm269_vm0, %v248_v22 }
  0x38   : > { %1227 = vmatmul.mubr.msk.f32.gmra.mxu0 %vm269_vm0, %v249_v23 }
  0x39   : > { %1229 = vmatprep.mubr.msk.f32.mxu0 %vm269_vm0, %v250_v24 }
  0x3c   : > { %1230 = vmatmul.mubr.msk.f32.gmra.mxu0 %vm269_vm0, %v251_v25 }
  0x3d   : > { %1232 = vmatprep.mubr.msk.f32.mxu0 %vm269_vm0, %v252_v26 }
  0x40   : > { %1233 = vmatmul.mubr.msk.f32.gmra.mxu0 %vm269_vm0, %v253_v27 }
  0x41   : > { %1235 = vmatprep.mubr.msk.f32.mxu0 %vm269_vm0, %v254_v28 }
  0x44   : > { %1236 = vmatmul.mubr.msk.f32.gmra.mxu0 %vm269_vm0, %v255_v29 }
  0x45   : > { %1238 = vmatprep.mubr.msk.f32.mxu0 %vm269_vm0, %v256_v30 }
  0x48   : > { %1239 = vmatmul.mubr.msk.f32.gmra.mxu0 %vm269_vm0, %v257_v31 }
  0x49   : > { %1241 = vmatprep.mubr.msk.f32.mxu0 %vm269_vm0, %v258_v32 }
  0x4c   : > { %1242 = vmatmul.mubr.msk.f32.gmra.mxu0 %vm269_vm0, %v259_v33 }
  0xd0   : > { %v1198_v39 = vpop.f32.mrf.mxu0 }
  0xd1   : > { %v438_v40 = vadd.f32 %v1198_v39, %v1449_v38 }
  0xd2   : > { %v432_v41 = vpop.f32.mrf.mxu0 }
  0xd3   : > { %v433_v42 = vadd.f32 %v1449_v38, %v432_v41  ;;  %v592_v45 = vmax.f32 %v438_v40, 0.0 }
  0xd4   : > { %v1201_v43 = vpop.f32.mrf.mxu0 }
  0xd5   : > { %v591_v44 = vmax.f32 %v433_v42, 0.0  ;;  %v448_v46 = vadd.f32 %v1201_v43, %v1449_v38 }
  0xd6   : > { %v442_v47 = vpop.f32.mrf.mxu0 }
  0xd7   : > { %v443_v48 = vadd.f32 %v1449_v38, %v442_v47  ;;  %1252 = vmatprep.mubr.msk.f32.mxu1 %vm634_vm1, %v591_v44  ;;  %v594_v51 = vmax.f32 %v448_v46, 0.0 }
  0xd8   : > { %v1204_v49 = vpop.f32.mrf.mxu0  ;;  %1253 = vmatmul.mubr.msk.f32.vlgmr.msra.gmra.mxu1 %vm634_vm1, %v592_v45 }
  0xd9   : > { %v593_v50 = vmax.f32 %v443_v48, 0.0  ;;  %v458_v52 = vadd.f32 %v1204_v49, %v1449_v38 }
  0xda   : > { %v452_v53 = vpop.f32.mrf.mxu0 }
  0xdb   : > { %v453_v54 = vadd.f32 %v1449_v38, %v452_v53  ;;  %1255 = vmatprep.mubr.msk.f32.mxu1 %vm634_vm1, %v593_v50  ;;  %v596_v57 = vmax.f32 %v458_v52, 0.0 }
  0xdc   : > { %v1207_v55 = vpop.f32.mrf.mxu0  ;;  %1256 = vmatmul.mubr.msk.f32.gmra.mxu1 %vm634_vm1, %v594_v51 }
  0xdd   : > { %v595_v56 = vmax.f32 %v453_v54, 0.0  ;;  %v468_v58 = vadd.f32 %v1207_v55, %v1449_v38 }
  0xde   : > { %v462_v59 = vpop.f32.mrf.mxu0 }
  0xdf   : > { %v463_v60 = vadd.f32 %v1449_v38, %v462_v59  ;;  %1258 = vmatprep.mubr.msk.f32.mxu1 %vm634_vm1, %v595_v56  ;;  %v598_v63 = vmax.f32 %v468_v58, 0.0 }
  0xe0   : > { %v1210_v61 = vpop.f32.mrf.mxu0  ;;  %1259 = vmatmul.mubr.msk.f32.gmra.mxu1 %vm634_vm1, %v596_v57 }
  0xe1   : > { %v597_v62 = vmax.f32 %v463_v60, 0.0  ;;  %v478_v0 = vadd.f32 %v1210_v61, %v1449_v38 }
  0xe2   : > { %v472_v1 = vpop.f32.mrf.mxu0 }
  0xe3   : > { %v473_v2 = vadd.f32 %v1449_v38, %v472_v1  ;;  %1261 = vmatprep.mubr.msk.f32.mxu1 %vm634_vm1, %v597_v62  ;;  %v600_v5 = vmax.f32 %v478_v0, 0.0 }
  0xe4   : > { %v1213_v3 = vpop.f32.mrf.mxu0  ;;  %1262 = vmatmul.mubr.msk.f32.gmra.mxu1 %vm634_vm1, %v598_v63 }
  0xe5   : > { %v599_v4 = vmax.f32 %v473_v2, 0.0  ;;  %v488_v6 = vadd.f32 %v1213_v3, %v1449_v38 }
  0xe6   : > { %v482_v7 = vpop.f32.mrf.mxu0 }
  0xe7   : > { %v483_v8 = vadd.f32 %v1449_v38, %v482_v7  ;;  %1264 = vmatprep.mubr.msk.f32.mxu1 %vm634_vm1, %v599_v4  ;;  %v602_v11 = vmax.f32 %v488_v6, 0.0 }
  0xe8   : > { %v1216_v9 = vpop.f32.mrf.mxu0  ;;  %1265 = vmatmul.mubr.msk.f32.gmra.mxu1 %vm634_vm1, %v600_v5 }
  0xe9   : > { %v601_v10 = vmax.f32 %v483_v8, 0.0  ;;  %v498_v12 = vadd.f32 %v1216_v9, %v1449_v38  ;;  %v1518_v8 = vld [vmem:[%s1630_s4] ss:$0 sm:$0xff] }
  0xea   : > { %v492_v13 = vpop.f32.mrf.mxu0 }
  0xeb   : > { %v493_v14 = vadd.f32 %v1449_v38, %v492_v13  ;;  %1267 = vmatprep.mubr.msk.f32.mxu1 %vm634_vm1, %v601_v10  ;;  %v604_v17 = vmax.f32 %v498_v12, 0.0 }
  0xec   : > { %v1219_v15 = vpop.f32.mrf.mxu0  ;;  %1268 = vmatmul.mubr.msk.f32.gmra.mxu1 %vm634_vm1, %v602_v11 }
  0xed   : > { %v603_v16 = vmax.f32 %v493_v14, 0.0  ;;  %v508_v18 = vadd.f32 %v1219_v15, %v1449_v38 }
  0xee   : > { %v502_v19 = vpop.f32.mrf.mxu0 }
  0xef   : > { %v503_v20 = vadd.f32 %v1449_v38, %v502_v19  ;;  %1270 = vmatprep.mubr.msk.f32.mxu1 %vm634_vm1, %v603_v16  ;;  %v606_v23 = vmax.f32 %v508_v18, 0.0 }
  0xf0   : > { %v1222_v21 = vpop.f32.mrf.mxu0  ;;  %1271 = vmatmul.mubr.msk.f32.gmra.mxu1 %vm634_vm1, %v604_v17 }
  0xf1   : > { %v605_v22 = vmax.f32 %v503_v20, 0.0  ;;  %v518_v24 = vadd.f32 %v1222_v21, %v1449_v38 }
  0xf2   : > { %v512_v25 = vpop.f32.mrf.mxu0 }
  0xf3   : > { %v513_v26 = vadd.f32 %v1449_v38, %v512_v25  ;;  %1273 = vmatprep.mubr.msk.f32.mxu1 %vm634_vm1, %v605_v22  ;;  %v608_v29 = vmax.f32 %v518_v24, 0.0 }
  0xf4   : > { %v1225_v27 = vpop.f32.mrf.mxu0  ;;  %1274 = vmatmul.mubr.msk.f32.gmra.mxu1 %vm634_vm1, %v606_v23 }
  0xf5   : > { %v607_v28 = vmax.f32 %v513_v26, 0.0  ;;  %v528_v30 = vadd.f32 %v1225_v27, %v1449_v38 }
  0xf6   : > { %v522_v31 = vpop.f32.mrf.mxu0 }
  0xf7   : > { %v523_v32 = vadd.f32 %v1449_v38, %v522_v31  ;;  %1276 = vmatprep.mubr.msk.f32.mxu1 %vm634_vm1, %v607_v28  ;;  %v610_v35 = vmax.f32 %v528_v30, 0.0 }
  0xf8   : > { %v1228_v33 = vpop.f32.mrf.mxu0  ;;  %1277 = vmatmul.mubr.msk.f32.gmra.mxu1 %vm634_vm1, %v608_v29 }
  0xf9   : > { %v609_v34 = vmax.f32 %v523_v32, 0.0  ;;  %v538_v36 = vadd.f32 %v1228_v33, %v1449_v38 }
  0xfa   : > { %v532_v37 = vpop.f32.mrf.mxu0 }
  0xfb   : > { %v533_v39 = vadd.f32 %v1449_v38, %v532_v37  ;;  %1279 = vmatprep.mubr.msk.f32.mxu1 %vm634_vm1, %v609_v34  ;;  %v612_v42 = vmax.f32 %v538_v36, 0.0 }
  0xfc   : > { %v1231_v40 = vpop.f32.mrf.mxu0  ;;  %1280 = vmatmul.mubr.msk.f32.gmra.mxu1 %vm634_vm1, %v610_v35 }
  0xfd   : > { %v611_v41 = vmax.f32 %v533_v39, 0.0  ;;  %v548_v43 = vadd.f32 %v1231_v40, %v1449_v38 }
  0xfe   : > { %v542_v44 = vpop.f32.mrf.mxu0 }
  0xff   : > { %v543_v45 = vadd.f32 %v1449_v38, %v542_v44  ;;  %1282 = vmatprep.mubr.msk.f32.mxu1 %vm634_vm1, %v611_v41  ;;  %v614_v48 = vmax.f32 %v548_v43, 0.0 }
 0x100   : > { %v1234_v46 = vpop.f32.mrf.mxu0  ;;  %1283 = vmatmul.mubr.msk.f32.gmra.mxu1 %vm634_vm1, %v612_v42 }
 0x101   : > { %v613_v47 = vmax.f32 %v543_v45, 0.0  ;;  %v558_v49 = vadd.f32 %v1234_v46, %v1449_v38 }
 0x102   : > { %v552_v50 = vpop.f32.mrf.mxu0 }
 0x103   : > { %v553_v51 = vadd.f32 %v1449_v38, %v552_v50  ;;  %1285 = vmatprep.mubr.msk.f32.mxu1 %vm634_vm1, %v613_v47  ;;  %v616_v54 = vmax.f32 %v558_v49, 0.0 }
 0x104   : > { %v1237_v52 = vpop.f32.mrf.mxu0  ;;  %1286 = vmatmul.mubr.msk.f32.gmra.mxu1 %vm634_vm1, %v614_v48 }
 0x105   : > { %v615_v53 = vmax.f32 %v553_v51, 0.0  ;;  %v568_v55 = vadd.f32 %v1237_v52, %v1449_v38 }
 0x106   : > { %v562_v56 = vpop.f32.mrf.mxu0 }
 0x107   : > { %v563_v57 = vadd.f32 %v1449_v38, %v562_v56  ;;  %1288 = vmatprep.mubr.msk.f32.mxu1 %vm634_vm1, %v615_v53  ;;  %v618_v60 = vmax.f32 %v568_v55, 0.0 }
 0x108   : > { %v1240_v58 = vpop.f32.mrf.mxu0  ;;  %1289 = vmatmul.mubr.msk.f32.gmra.mxu1 %vm634_vm1, %v616_v54 }
 0x109   : > { %v617_v59 = vmax.f32 %v563_v57, 0.0  ;;  %v578_v61 = vadd.f32 %v1240_v58, %v1449_v38 }
 0x10a   : > { %v572_v62 = vpop.f32.mrf.mxu0 }
 0x10b   : > { %v573_v63 = vadd.f32 %v1449_v38, %v572_v62  ;;  %1291 = vmatprep.mubr.msk.f32.mxu1 %vm634_vm1, %v617_v59  ;;  %v620_v2 = vmax.f32 %v578_v61, 0.0 }
 0x10c   : > { %v1243_v0 = vpop.f32.mrf.mxu0  ;;  %1292 = vmatmul.mubr.msk.f32.gmra.mxu1 %vm634_vm1, %v618_v60 }
 0x10d   : > { %v619_v1 = vmax.f32 %v573_v63, 0.0  ;;  %v588_v3 = vadd.f32 %v1243_v0, %v1449_v38 }
 0x10e   : > { %v582_v4 = vpop.f32.mrf.mxu0 }
 0x10f   : > { %v583_v5 = vadd.f32 %v1449_v38, %v582_v4  ;;  %1294 = vmatprep.mubr.msk.f32.mxu1 %vm634_vm1, %v619_v1  ;;  %v622_v7 = vmax.f32 %v588_v3, 0.0 }
 0x110   : > { %1295 = vmatmul.mubr.msk.f32.gmra.mxu1 %vm634_vm1, %v620_v2 }
 0x111   : > { %v621_v6 = vmax.f32 %v583_v5, 0.0 }
 0x113   : > { %1297 = vmatprep.mubr.msk.f32.mxu1 %vm634_vm1, %v621_v6 }
 0x114   : > { %1298 = vmatmul.mubr.msk.f32.gmra.mxu1 %vm634_vm1, %v622_v7 }
 0x198   : > { %v1254_v38 = vpop.f32.mrf.mxu1 }
 0x199   : > { %v803_v9 = vadd.f32 %v1254_v38, %v1518_v8 }
 0x19a   : > { %v797_v10 = vpop.f32.mrf.mxu1 }
 0x19b   : > { %958 = vst.msk [vmem:[%s1525_s19 + $0x8] sm:$0xff] %vm956_vm2, %v803_v9  ;;  %v798_v11 = vadd.f32 %v1518_v8, %v797_v10 }
 0x19c   : > { %v1257_v12 = vpop.f32.mrf.mxu1 }
 0x19d   : > { %957 = vst.msk [vmem:[%s1525_s19] sm:$0xff] %vm956_vm2, %v798_v11  ;;  %v813_v13 = vadd.f32 %v1257_v12, %v1518_v8 }
 0x19e   : > { %v807_v14 = vpop.f32.mrf.mxu1 }
 0x19f   : > { %960 = vst.msk [vmem:[%s1525_s19 + $0x18] sm:$0xff] %vm956_vm2, %v813_v13  ;;  %v808_v15 = vadd.f32 %v1518_v8, %v807_v14 }
 0x1a0   : > { %v1260_v16 = vpop.f32.mrf.mxu1 }
 0x1a1   : > { %959 = vst.msk [vmem:[%s1525_s19 + $0x10] sm:$0xff] %vm956_vm2, %v808_v15  ;;  %v823_v17 = vadd.f32 %v1260_v16, %v1518_v8 }
 0x1a2   : > { %v817_v18 = vpop.f32.mrf.mxu1 }
 0x1a3   : > { %962 = vst.msk [vmem:[%s1525_s19 + $0x28] sm:$0xff] %vm956_vm2, %v823_v17  ;;  %v818_v19 = vadd.f32 %v1518_v8, %v817_v18 }
 0x1a4   : > { %v1263_v20 = vpop.f32.mrf.mxu1 }
 0x1a5   : > { %961 = vst.msk [vmem:[%s1525_s19 + $0x20] sm:$0xff] %vm956_vm2, %v818_v19  ;;  %v833_v21 = vadd.f32 %v1263_v20, %v1518_v8 }
 0x1a6   : > { %v827_v22 = vpop.f32.mrf.mxu1 }
 0x1a7   : > { %964 = vst.msk [vmem:[%s1525_s19 + $0x38] sm:$0xff] %vm956_vm2, %v833_v21  ;;  %v828_v23 = vadd.f32 %v1518_v8, %v827_v22 }
 0x1a8   : > { %v1266_v24 = vpop.f32.mrf.mxu1 }
 0x1a9   : > { %963 = vst.msk [vmem:[%s1525_s19 + $0x30] sm:$0xff] %vm956_vm2, %v828_v23  ;;  %v843_v25 = vadd.f32 %v1266_v24, %v1518_v8 }
 0x1aa   : > { %v837_v26 = vpop.f32.mrf.mxu1 }
 0x1ab   : > { %966 = vst.msk [vmem:[%s1525_s19 + $0x48] sm:$0xff] %vm956_vm2, %v843_v25  ;;  %v838_v27 = vadd.f32 %v1518_v8, %v837_v26 }
 0x1ac   : > { %v1269_v28 = vpop.f32.mrf.mxu1 }
 0x1ad   : > { %965 = vst.msk [vmem:[%s1525_s19 + $0x40] sm:$0xff] %vm956_vm2, %v838_v27  ;;  %v853_v29 = vadd.f32 %v1269_v28, %v1518_v8 }
 0x1ae   : > { %v847_v30 = vpop.f32.mrf.mxu1 }
 0x1af   : > { %968 = vst.msk [vmem:[%s1525_s19 + $0x58] sm:$0xff] %vm956_vm2, %v853_v29  ;;  %v848_v31 = vadd.f32 %v1518_v8, %v847_v30 }
 0x1b0   : > { %v1272_v32 = vpop.f32.mrf.mxu1 }
 0x1b1   : > { %967 = vst.msk [vmem:[%s1525_s19 + $0x50] sm:$0xff] %vm956_vm2, %v848_v31  ;;  %v863_v33 = vadd.f32 %v1272_v32, %v1518_v8 }
 0x1b2   : > { %v857_v34 = vpop.f32.mrf.mxu1 }
 0x1b3   : > { %970 = vst.msk [vmem:[%s1525_s19 + $0x68] sm:$0xff] %vm956_vm2, %v863_v33  ;;  %v858_v35 = vadd.f32 %v1518_v8, %v857_v34 }
 0x1b4   : > { %v1275_v36 = vpop.f32.mrf.mxu1 }
 0x1b5   : > { %969 = vst.msk [vmem:[%s1525_s19 + $0x60] sm:$0xff] %vm956_vm2, %v858_v35  ;;  %v873_v37 = vadd.f32 %v1275_v36, %v1518_v8 }
 0x1b6   : > { %v867_v39 = vpop.f32.mrf.mxu1 }
 0x1b7   : > { %972 = vst.msk [vmem:[%s1525_s19 + $0x78] sm:$0xff] %vm956_vm2, %v873_v37  ;;  %v868_v40 = vadd.f32 %v1518_v8, %v867_v39 }
 0x1b8   : > { %v1278_v41 = vpop.f32.mrf.mxu1 }
 0x1b9   : > { %971 = vst.msk [vmem:[%s1525_s19 + $0x70] sm:$0xff] %vm956_vm2, %v868_v40  ;;  %v883_v42 = vadd.f32 %v1278_v41, %v1518_v8 }
 0x1ba   : > { %v877_v43 = vpop.f32.mrf.mxu1 }
 0x1bb   : > { %974 = vst.msk [vmem:[%s1525_s19 + $0x88] sm:$0xff] %vm956_vm2, %v883_v42  ;;  %v878_v44 = vadd.f32 %v1518_v8, %v877_v43 }
 0x1bc   : > { %v1281_v45 = vpop.f32.mrf.mxu1 }
 0x1bd   : > { %973 = vst.msk [vmem:[%s1525_s19 + $0x80] sm:$0xff] %vm956_vm2, %v878_v44  ;;  %v893_v46 = vadd.f32 %v1281_v45, %v1518_v8 }
 0x1be   : > { %v887_v47 = vpop.f32.mrf.mxu1 }
 0x1bf   : > { %976 = vst.msk [vmem:[%s1525_s19 + $0x98] sm:$0xff] %vm956_vm2, %v893_v46  ;;  %v888_v48 = vadd.f32 %v1518_v8, %v887_v47 }
 0x1c0   : > { %v1284_v49 = vpop.f32.mrf.mxu1 }
 0x1c1   : > { %975 = vst.msk [vmem:[%s1525_s19 + $0x90] sm:$0xff] %vm956_vm2, %v888_v48  ;;  %v903_v50 = vadd.f32 %v1284_v49, %v1518_v8 }
 0x1c2   : > { %v897_v51 = vpop.f32.mrf.mxu1 }
 0x1c3   : > { %978 = vst.msk [vmem:[%s1525_s19 + $0xa8] sm:$0xff] %vm956_vm2, %v903_v50  ;;  %v898_v52 = vadd.f32 %v1518_v8, %v897_v51 }
 0x1c4   : > { %v1287_v53 = vpop.f32.mrf.mxu1 }
 0x1c5   : > { %977 = vst.msk [vmem:[%s1525_s19 + $0xa0] sm:$0xff] %vm956_vm2, %v898_v52  ;;  %v913_v54 = vadd.f32 %v1287_v53, %v1518_v8 }
 0x1c6   : > { %v907_v55 = vpop.f32.mrf.mxu1 }
 0x1c7   : > { %980 = vst.msk [vmem:[%s1525_s19 + $0xb8] sm:$0xff] %vm956_vm2, %v913_v54  ;;  %v908_v56 = vadd.f32 %v1518_v8, %v907_v55 }
 0x1c8   : > { %v1290_v57 = vpop.f32.mrf.mxu1 }
 0x1c9   : > { %979 = vst.msk [vmem:[%s1525_s19 + $0xb0] sm:$0xff] %vm956_vm2, %v908_v56  ;;  %v923_v58 = vadd.f32 %v1290_v57, %v1518_v8 }
 0x1ca   : > { %v917_v59 = vpop.f32.mrf.mxu1 }
 0x1cb   : > { %982 = vst.msk [vmem:[%s1525_s19 + $0xc8] sm:$0xff] %vm956_vm2, %v923_v58  ;;  %v918_v60 = vadd.f32 %v1518_v8, %v917_v59 }
 0x1cc   : > { %v1293_v61 = vpop.f32.mrf.mxu1 }
 0x1cd   : > { %981 = vst.msk [vmem:[%s1525_s19 + $0xc0] sm:$0xff] %vm956_vm2, %v918_v60  ;;  %v933_v62 = vadd.f32 %v1293_v61, %v1518_v8 }
 0x1ce   : > { %v927_v63 = vpop.f32.mrf.mxu1 }
 0x1cf   : > { %984 = vst.msk [vmem:[%s1525_s19 + $0xd8] sm:$0xff] %vm956_vm2, %v933_v62  ;;  %v928_v0 = vadd.f32 %v1518_v8, %v927_v63 }
 0x1d0   : > { %v1296_v1 = vpop.f32.mrf.mxu1 }
 0x1d1   : > { %983 = vst.msk [vmem:[%s1525_s19 + $0xd0] sm:$0xff] %vm956_vm2, %v928_v0  ;;  %v943_v2 = vadd.f32 %v1296_v1, %v1518_v8 }
 0x1d2   : > { %v937_v3 = vpop.f32.mrf.mxu1 }
 0x1d3   : > { %986 = vst.msk [vmem:[%s1525_s19 + $0xe8] sm:$0xff] %vm956_vm2, %v943_v2  ;;  %v938_v4 = vadd.f32 %v1518_v8, %v937_v3 }
 0x1d4   : > { %v1299_v5 = vpop.f32.mrf.mxu1 }
 0x1d5   : > { %985 = vst.msk [vmem:[%s1525_s19 + $0xe0] sm:$0xff] %vm956_vm2, %v938_v4  ;;  %v953_v6 = vadd.f32 %v1299_v5, %v1518_v8 }
 0x1d6   : > { %v947_v7 = vpop.f32.mrf.mxu1 }
 0x1d7   : > { %988 = vst.msk [vmem:[%s1525_s19 + $0xf8] sm:$0xff] %vm956_vm2, %v953_v6  ;;  %v948_v38 = vadd.f32 %v1518_v8, %v947_v7 }
 0x1d9   : > { %987 = vst.msk [vmem:[%s1525_s19 + $0xf0] sm:$0xff] %vm956_vm2, %v948_v38 }
 0x1da PF: > { %s15_s18 = sadd.s32 1, %s1314_s18  }
 0x1db   : > { %p12_p4 = scmp.ge.s32.totalorder %s15_s18, 6  }
 0x1dd   :  { %14 = sbr.rel (!%p12_p4) target bundleno = 1 (0x1), region = 70 }

</bundles_post_ra>
